<compile_context>
chip_gen: v5e
topology: v5e:2x2
jax: 0.10.0
libtpu: 0.0.40
codegen_flags: <defaults>
</compile_context>

<pallas_src>
import jax
import jax.numpy as jnp
from jax.experimental import pallas as pl
from jax.experimental.pallas import tpu as pltpu

LANE = 128
SUBLANE = 8


def _round_up(x: int, m: int) -> int:
    return ((x + m - 1) // m) * m


def _pad_to(a, shape):
    pads = [(0, t - s) for s, t in zip(a.shape, shape)]
    return jnp.pad(a, pads)


def fnn_kernel(x_ref, w1_ref, b1_ref, w2_ref, b2_ref, w3_ref, b3_ref, o_ref):
    x = x_ref[...]                                              # (TM, K) bf16
    # Layer 1: Linear (bf16 MXU, f32 accumulate) + bias + ReLU (f32)
    h1 = jnp.dot(x, w1_ref[...], preferred_element_type=jnp.float32)
    h1 = jnp.maximum(h1 + b1_ref[...], 0.0)
    # Layer 2: Linear + ReLU
    h2 = jnp.dot(h1.astype(jnp.bfloat16), w2_ref[...],
                 preferred_element_type=jnp.float32)
    h2 = jnp.maximum(h2 + b2_ref[...], 0.0)
    # Layer 3: Linear (no activation) — lane-dense (TM, 128) store.
    out = jnp.dot(h2.astype(jnp.bfloat16), w3_ref[...],
                  preferred_element_type=jnp.float32)
    o_ref[...] = (out + b3_ref[...]).astype(o_ref.dtype)


def fnn_forward(x, w1, b1, w2, b2, w3, b3, *, block_m=512):
    batch, in_dim = x.shape
    hidden = w1.shape[1]
    num_classes = w3.shape[1]

    # --- lane-pad feature dims to multiples of 128 (zero padding is exact) ---
    hid_p = _round_up(hidden, LANE)
    out_p = _round_up(num_classes, LANE)

    w1p = _pad_to(w1, (in_dim, hid_p)).astype(jnp.bfloat16)
    b1p = _pad_to(b1, (1, hid_p)).astype(jnp.float32)
    w2p = _pad_to(w2, (hid_p, hid_p)).astype(jnp.bfloat16)
    b2p = _pad_to(b2, (1, hid_p)).astype(jnp.float32)
    w3p = _pad_to(w3, (hid_p, out_p)).astype(jnp.bfloat16)
    b3p = _pad_to(b3, (1, out_p)).astype(jnp.float32)

    # --- batch tiling: large TM tiles, pad batch to a multiple of TM ---------
    tm = min(block_m, _round_up(batch, SUBLANE))
    batch_p = _round_up(batch, tm)
    xp = _pad_to(x, (batch_p, in_dim)).astype(jnp.bfloat16)

    grid = (batch_p // tm,)

    def resident(shape):
        # Same block index every grid step -> stays resident in VMEM.
        return pl.BlockSpec(shape, lambda i: (0, 0))

    out_padded = pl.pallas_call(
        fnn_kernel,
        out_shape=jax.ShapeDtypeStruct((batch_p, out_p), jnp.float32),
        grid=grid,
        in_specs=[
            pl.BlockSpec((tm, in_dim), lambda i: (i, 0)),   # x streams by batch
            resident(w1p.shape), resident(b1p.shape),
            resident(w2p.shape), resident(b2p.shape),
            resident(w3p.shape), resident(b3p.shape),
        ],
        out_specs=pl.BlockSpec((tm, out_p), lambda i: (i, 0)),
        compiler_params=pltpu.CompilerParams(
            dimension_semantics=("parallel",)),
    )(xp, w1p, b1p, w2p, b2p, w3p, b3p)

    # Slice away batch padding and lane padding of the logits.
    return out_padded[:batch, :num_classes]


def init_params(key, input_shape, hidden_shape, num_classes):
    """Deterministic PyTorch-Linear-style init: U(-1/sqrt(fan_in), 1/sqrt(fan_in)).
    Weights stored as (in_features, out_features) so kernel computes x @ W + b
    (equivalent to PyTorch's x @ W.T + b)."""
    ks = jax.random.split(key, 6)

    def linear(kw, kb, fan_in, fan_out):
        bound = 1.0 / jnp.sqrt(float(fan_in))
        w = jax.random.uniform(kw, (fan_in, fan_out), jnp.float32, -bound, bound)
        b = jax.random.uniform(kb, (1, fan_out), jnp.float32, -bound, bound)
        return w, b

    w1, b1 = linear(ks[0], ks[1], input_shape, hidden_shape)
    w2, b2 = linear(ks[2], ks[3], hidden_shape, hidden_shape)
    w3, b3 = linear(ks[4], ks[5], hidden_shape, num_classes)
    return w1, b1, w2, b2, w3, b3


if __name__ == "__main__":
    # FNN(input_shape=64, hidden_shape=32, num_classes=10, activation_func=nn.ReLU)
    batch, input_shape, hidden_shape, num_classes = 8, 64, 32, 10

    key = jax.random.PRNGKey(0)
    kx, kp = jax.random.split(key)
    x = jax.random.normal(kx, (batch, input_shape), jnp.float32)
    params = init_params(kp, input_shape, hidden_shape, num_classes)

    out = fnn_forward(x, *params)
    out = jax.block_until_ready(out)

    # Reference in plain JAX using the same bf16-weight / f32-accumulate math.
    w1, b1, w2, b2, w3, b3 = params
    xb = x.astype(jnp.bfloat16)
    h1 = jnp.maximum(
        jnp.dot(xb, w1.astype(jnp.bfloat16), preferred_element_type=jnp.float32) + b1, 0.0)
    h2 = jnp.maximum(
        jnp.dot(h1.astype(jnp.bfloat16), w2.astype(jnp.bfloat16),
                preferred_element_type=jnp.float32) + b2, 0.0)
    ref = jnp.dot(h2.astype(jnp.bfloat16), w3.astype(jnp.bfloat16),
                  preferred_element_type=jnp.float32) + b3

    assert out.shape == (batch, num_classes)
    assert jnp.allclose(out, ref, atol=1e-3, rtol=1e-3), \
        float(jnp.max(jnp.abs(out - ref)))

    print("KERNEL_OK")
</pallas_src>

<mosaic_0001>
module attributes {stable_mosaic.version = 11 : i64} {
  func.func @fnn_kernel(%arg0: i32, %arg1: memref<8x64xbf16, #tpu.memory_space<vmem>>, %arg2: memref<64x128xbf16, #tpu.memory_space<vmem>>, %arg3: memref<1x128xf32, #tpu.memory_space<vmem>>, %arg4: memref<128x128xbf16, #tpu.memory_space<vmem>>, %arg5: memref<1x128xf32, #tpu.memory_space<vmem>>, %arg6: memref<128x128xbf16, #tpu.memory_space<vmem>>, %arg7: memref<1x128xf32, #tpu.memory_space<vmem>>, %arg8: memref<8x128xf32, #tpu.memory_space<vmem>>) attributes {dimension_semantics = [#tpu.dimension_semantics<parallel>], iteration_bounds = array<i64: 1>, scalar_prefetch = 0 : i64, scratch_operands = 0 : i64, tpu.core_type = #tpu.core_type<tc>, window_params = [{transform_indices = @transform_0, window_bounds = array<i64: 8, 64>}, {pipeline_mode = #tpu.pipeline_mode<synchronous>, transform_indices = @transform_1, window_bounds = array<i64: 64, 128>}, {pipeline_mode = #tpu.pipeline_mode<synchronous>, transform_indices = @transform_2, window_bounds = array<i64: 1, 128>}, {pipeline_mode = #tpu.pipeline_mode<synchronous>, transform_indices = @transform_3, window_bounds = array<i64: 128, 128>}, {pipeline_mode = #tpu.pipeline_mode<synchronous>, transform_indices = @transform_4, window_bounds = array<i64: 1, 128>}, {pipeline_mode = #tpu.pipeline_mode<synchronous>, transform_indices = @transform_5, window_bounds = array<i64: 128, 128>}, {pipeline_mode = #tpu.pipeline_mode<synchronous>, transform_indices = @transform_6, window_bounds = array<i64: 1, 128>}, {transform_indices = @transform_7, window_bounds = array<i64: 8, 128>}]} {
    %c0 = arith.constant 0 : index
    %c0_0 = arith.constant 0 : index
    %0 = vector.load %arg1[%c0, %c0_0] : memref<8x64xbf16, #tpu.memory_space<vmem>>, vector<8x64xbf16>
    %c0_1 = arith.constant 0 : index
    %c0_2 = arith.constant 0 : index
    %1 = vector.load %arg2[%c0_1, %c0_2] : memref<64x128xbf16, #tpu.memory_space<vmem>>, vector<64x128xbf16>
    %cst = arith.constant dense<0.000000e+00> : vector<8x128xf32>
    %2 = tpu.matmul %0, %1, %cst {dimension_numbers = #tpu.dot_dimension_numbers<[1], [0], [0], [1], [0, 0, 1, 1], [], []>} : vector<8x64xbf16>, vector<64x128xbf16>, vector<8x128xf32> -> vector<8x128xf32>
    %c0_3 = arith.constant 0 : index
    %c0_4 = arith.constant 0 : index
    %3 = vector.load %arg3[%c0_3, %c0_4] : memref<1x128xf32, #tpu.memory_space<vmem>>, vector<1x128xf32>
    %4 = vector.broadcast %3 : vector<1x128xf32> to vector<8x128xf32>
    %5 = arith.addf %2, %4 : vector<8x128xf32>
    %cst_5 = arith.constant 0.000000e+00 : f32
    %6 = vector.broadcast %cst_5 : f32 to vector<8x128xf32>
    %7 = arith.maximumf %5, %6 : vector<8x128xf32>
    %8 = arith.truncf %7 : vector<8x128xf32> to vector<8x128xbf16>
    %c0_6 = arith.constant 0 : index
    %c0_7 = arith.constant 0 : index
    %9 = vector.load %arg4[%c0_6, %c0_7] : memref<128x128xbf16, #tpu.memory_space<vmem>>, vector<128x128xbf16>
    %cst_8 = arith.constant dense<0.000000e+00> : vector<8x128xf32>
    %10 = tpu.matmul %8, %9, %cst_8 {dimension_numbers = #tpu.dot_dimension_numbers<[1], [0], [0], [1], [0, 0, 1, 1], [], []>} : vector<8x128xbf16>, vector<128x128xbf16>, vector<8x128xf32> -> vector<8x128xf32>
    %c0_9 = arith.constant 0 : index
    %c0_10 = arith.constant 0 : index
    %11 = vector.load %arg5[%c0_9, %c0_10] : memref<1x128xf32, #tpu.memory_space<vmem>>, vector<1x128xf32>
    %12 = vector.broadcast %11 : vector<1x128xf32> to vector<8x128xf32>
    %13 = arith.addf %10, %12 : vector<8x128xf32>
    %cst_11 = arith.constant 0.000000e+00 : f32
    %14 = vector.broadcast %cst_11 : f32 to vector<8x128xf32>
    %15 = arith.maximumf %13, %14 : vector<8x128xf32>
    %16 = arith.truncf %15 : vector<8x128xf32> to vector<8x128xbf16>
    %c0_12 = arith.constant 0 : index
    %c0_13 = arith.constant 0 : index
    %17 = vector.load %arg6[%c0_12, %c0_13] : memref<128x128xbf16, #tpu.memory_space<vmem>>, vector<128x128xbf16>
    %cst_14 = arith.constant dense<0.000000e+00> : vector<8x128xf32>
    %18 = tpu.matmul %16, %17, %cst_14 {dimension_numbers = #tpu.dot_dimension_numbers<[1], [0], [0], [1], [0, 0, 1, 1], [], []>} : vector<8x128xbf16>, vector<128x128xbf16>, vector<8x128xf32> -> vector<8x128xf32>
    %c0_15 = arith.constant 0 : index
    %c0_16 = arith.constant 0 : index
    %19 = vector.load %arg7[%c0_15, %c0_16] : memref<1x128xf32, #tpu.memory_space<vmem>>, vector<1x128xf32>
    %20 = vector.broadcast %19 : vector<1x128xf32> to vector<8x128xf32>
    %21 = arith.addf %18, %20 : vector<8x128xf32>
    %c0_17 = arith.constant 0 : index
    %c0_18 = arith.constant 0 : index
    %22 = vector.load %arg8[%c0_17, %c0_18] : memref<8x128xf32, #tpu.memory_space<vmem>>, vector<8x128xf32>
    tpu.vector_store %arg8[%c0_17, %c0_18], %21 {strides = array<i32>} : memref<8x128xf32, #tpu.memory_space<vmem>>, vector<8x128xf32>,
    return
  }
  func.func @transform_0(%arg0: i32) -> (i32, i32) {
    %c0_i32 = arith.constant 0 : i32
    %c0_i32_0 = arith.constant 0 : i32
    return %arg0, %c0_i32 : i32, i32
  }
  func.func @transform_1(%arg0: i32) -> (i32, i32) {
    %c0_i32 = arith.constant 0 : i32
    %c0_i32_0 = arith.constant 0 : i32
    %c0_i32_1 = arith.constant 0 : i32
    return %c0_i32, %c0_i32_0 : i32, i32
  }
  func.func @transform_2(%arg0: i32) -> (i32, i32) {
    %c0_i32 = arith.constant 0 : i32
    %c0_i32_0 = arith.constant 0 : i32
    %c0_i32_1 = arith.constant 0 : i32
    return %c0_i32, %c0_i32_0 : i32, i32
  }
  func.func @transform_3(%arg0: i32) -> (i32, i32) {
    %c0_i32 = arith.constant 0 : i32
    %c0_i32_0 = arith.constant 0 : i32
    %c0_i32_1 = arith.constant 0 : i32
    return %c0_i32, %c0_i32_0 : i32, i32
  }
  func.func @transform_4(%arg0: i32) -> (i32, i32) {
    %c0_i32 = arith.constant 0 : i32
    %c0_i32_0 = arith.constant 0 : i32
    %c0_i32_1 = arith.constant 0 : i32
    return %c0_i32, %c0_i32_0 : i32, i32
  }
  func.func @transform_5(%arg0: i32) -> (i32, i32) {
    %c0_i32 = arith.constant 0 : i32
    %c0_i32_0 = arith.constant 0 : i32
    %c0_i32_1 = arith.constant 0 : i32
    return %c0_i32, %c0_i32_0 : i32, i32
  }
  func.func @transform_6(%arg0: i32) -> (i32, i32) {
    %c0_i32 = arith.constant 0 : i32
    %c0_i32_0 = arith.constant 0 : i32
    %c0_i32_1 = arith.constant 0 : i32
    return %c0_i32, %c0_i32_0 : i32, i32
  }
  func.func @transform_7(%arg0: i32) -> (i32, i32) {
    %c0_i32 = arith.constant 0 : i32
    %c0_i32_0 = arith.constant 0 : i32
    return %arg0, %c0_i32 : i32, i32
  }
}

</mosaic_0001>

<bundles_post_ra>
// kernel: tpu_custom_call.1
= control target key start
LH: loop header
LB: loop body
LE: loop exit
PB: predicated region body
PF: predicated region fallthrough
CT: control target
= control target key end

     0   :  { %12 = vsyncpa [#allocation3], 0  ;;  %s639_s0 = inlined_call_operand.hbm [shape: bf16[8,64], index: 0, kind: input, shape index: {}]   ;;  %s640_s1 = inlined_call_operand.hbm [shape: bf16[64,128], index: 1, kind: input, shape index: {}]   ;;  %s641_s2 = inlined_call_operand.vmem [shape: f32[1,128], index: 2, kind: input, shape index: {}]   ;;  %s642_s3 = inlined_call_operand.hbm [shape: bf16[128,128], index: 3, kind: input, shape index: {}]   ;;  %s643_s4 = inlined_call_operand.vmem [shape: f32[1,128], index: 4, kind: input, shape index: {}]   ;;  %s644_s5 = inlined_call_operand.hbm [shape: bf16[128,128], index: 5, kind: input, shape index: {}]   ;;  %s645_s6 = inlined_call_operand.vmem [shape: f32[1,128], index: 6, kind: input, shape index: {}]   ;;  %s646_s7 = inlined_call_operand.hbm [shape: f32[8,128], index: 7, kind: output, shape index: {}]  }
   0x1   :  { %13 = vsyncpa [#allocation6], 0 }
   0x2   :  { %14 = vsyncpa [#allocation9], 0  ;;  %s31_s26 = sshll.u32 %s640_s1, 4  ;;  %s32_s26 = int_to_ptr.hbm [resolvable:$true] %s31_s26 }
   0x3   :  { %15 = vsyncpa [#allocation4], 0  ;;  %s568_s27 = smov [#allocation5]   ;;  %s21_s8 = sshll.u32 %s639_s0, 4  ;;  %s22_s8 = int_to_ptr.hbm [resolvable:$true] %s21_s8 }
   0x4   :  { %s33_s28 = sshll.u32 %s568_s27, 4  ;;  %s569_s9 = smov 64   ;;  %s34_s28 = int_to_ptr.vmem [resolvable:$true] %s33_s28 }
   0x5   :  { %s570_s10 = smov 4   ;;  %s571_s11 = smov [#allocation2]  }
   0x6   :  { %39 = dma.hbm_to_vmem [thread:$0]  %s32_s26, 512, %s34_s28, [#allocation6], %s569_s9, %s569_s9, %s570_s10  }
   0x7   :  { %s23_s12 = sshll.u32 %s571_s11, 4  ;;  %s46_s15 = sshll.u32 %s642_s3, 4  ;;  %s24_s12 = int_to_ptr.vmem [resolvable:$true] %s23_s12  ;;  %s47_s15 = int_to_ptr.hbm [resolvable:$true] %s46_s15 }
   0x8   :  { %26 = dma.hbm_to_vmem [thread:$0]  %s22_s8, 64, %s24_s12, [#allocation3]  }
   0x9   :  { %s61_s17 = sshll.u32 %s644_s5, 4  ;;  %s572_s18 = smov [#allocation7]   ;;  %s62_s17 = int_to_ptr.hbm [resolvable:$true] %s61_s17 }
   0xa   :  { %s48_s19 = sshll.u32 %s572_s18, 4  ;;  %s573_s0 = smov [#allocation8]   ;;  %s49_s19 = int_to_ptr.vmem [resolvable:$true] %s48_s19 }
   0xb   :  { %54 = dma.hbm_to_vmem [thread:$0]  %s47_s15, 1024, %s49_s19, [#allocation6], %s569_s9, %s569_s9, %s570_s10  }
   0xc   :  { %s63_s20 = sshll.u32 %s573_s0, 4  ;;  %s64_s20 = int_to_ptr.vmem [resolvable:$true] %s63_s20 }
   0xd   :  { %69 = dma.hbm_to_vmem [thread:$0]  %s62_s17, 1024, %s64_s20, [#allocation9], %s569_s9, %s569_s9, %s570_s10  }
   0xe   :  { %560 = dma.done.wait [#allocation3], 64  }
   0xf   :  { %561 = vsyncadd [#allocation3], 4294967232 }
  0x10   :  { %562 = dma.done.wait [#allocation6], 1536  }
  0x11   :  { %563 = vsyncadd [#allocation6], 4294965760 }
  0x12   :  { %564 = dma.done.wait [#allocation9], 1024  }
  0x13   :  { %565 = vsyncadd [#allocation9], 4294966272  ;;  %v413_v0 = vld [vmem:[#allocation5 + $0x18] sm:$0xff]  ;;  %v412_v2 = vld [vmem:[#allocation5 + $0x10] sm:$0xff]  ;;  %vm126_vm0 = vcmask 523264   ;;  %s574_s24 = smov [#allocation10]  }
  0x14   :  { %v421_v1 = vld [vmem:[#allocation7 + $0x38] sm:$0xff]  ;;  %134 = vmatpush.bf16.msra.mxu0 %v413_v0  ;;  %v420_v3 = vld [vmem:[#allocation7 + $0x30] sm:$0xff]  ;;  %v411_v4 = vld [vmem:[#allocation5 + $0x8] sm:$0xff]  ;;  %s315_s25 = sshll.u32 %s574_s24, 4  ;;  %s317_s28 = sshll.u32 %s646_s7, 4  ;;  %s316_s25 = int_to_ptr.vmem [resolvable:$true] %s315_s25  ;;  %s318_s28 = int_to_ptr.hbm [resolvable:$true] %s317_s28 }
  0x15   :  { %213 = vmatpush.bf16.msra.mxu1 %v421_v1  ;;  %v419_v5 = vld [vmem:[#allocation7 + $0x28] sm:$0xff]  ;;  %v410_v6 = vld [vmem:[#allocation5] sm:$0xff]  ;;  %v89_v8 = vld [vmem:[#allocation2] sm:$0xf] }
  0x16   :  { %v418_v7 = vld [vmem:[#allocation7 + $0x20] sm:$0xff]  ;;  %v417_v9 = vld [vmem:[#allocation7 + $0x18] sm:$0xff]  ;;  %v416_v10 = vld [vmem:[#allocation7 + $0x10] sm:$0xff] }
  0x17   :  { %v415_v11 = vld [vmem:[#allocation7 + $0x8] sm:$0xff]  ;;  %v414_v12 = vld [vmem:[#allocation7] sm:$0xff]  ;;  %v429_v13 = vld [vmem:[#allocation8 + $0x38] sm:$0xff] }
  0x18   :  { %135 = vmatpush.bf16.msra.mxu0 %v412_v2  ;;  %296 = vmatpush.bf16.msra.mxu2 %v429_v13  ;;  %v428_v14 = vld [vmem:[#allocation8 + $0x30] sm:$0xff]  ;;  %v427_v15 = vld [vmem:[#allocation8 + $0x28] sm:$0xff]  ;;  %v426_v16 = vld [vmem:[#allocation8 + $0x20] sm:$0xff] }
  0x19   :  { %214 = vmatpush.bf16.msra.mxu1 %v420_v3  ;;  %v425_v17 = vld [vmem:[#allocation8 + $0x18] sm:$0xff]  ;;  %v424_v18 = vld [vmem:[#allocation8 + $0x10] sm:$0xff]  ;;  %v423_v25 = vld [vmem:[#allocation8 + $0x8] sm:$0xff] }
  0x1a   :  { %v437_v19 = vld [vmem:[%s641_s2] ss:$0 sm:$0xff]  ;;  %v422_v26 = vld [vmem:[#allocation8] sm:$0xff] }
  0x1b   :  { %v438_v27 = vld [vmem:[%s643_s4] ss:$0 sm:$0xff] }
  0x1c   :  { %136 = vmatpush.bf16.msra.mxu0 %v411_v4  ;;  %297 = vmatpush.bf16.msra.mxu2 %v428_v14  ;;  %v439_v33 = vld [vmem:[%s645_s6] ss:$0 sm:$0xff] }
  0x1d   :  { %215 = vmatpush.bf16.msra.mxu1 %v419_v5 }
  0x20   :  { %137 = vmatpush.bf16.msra.mxu0 %v410_v6  ;;  %298 = vmatpush.bf16.msra.mxu2 %v427_v15 }
  0x21   :  { %216 = vmatpush.bf16.msra.mxu1 %v418_v7 }
  0x23   :  { %345 = vmatmul.msk.bf16.vlgmr.msra.gmra.mxu0 %vm126_vm0, %v89_v8 }
  0x24   :  { %299 = vmatpush.bf16.msra.mxu2 %v426_v16 }
  0x25   :  { %217 = vmatpush.bf16.msra.mxu1 %v417_v9 }
  0x28   :  { %300 = vmatpush.bf16.msra.mxu2 %v425_v17 }
  0x29   :  { %218 = vmatpush.bf16.msra.mxu1 %v416_v10 }
  0x2c   :  { %301 = vmatpush.bf16.msra.mxu2 %v424_v18 }
  0x2d   :  { %219 = vmatpush.bf16.msra.mxu1 %v415_v11 }
  0x30   :  { %302 = vmatpush.bf16.msra.mxu2 %v423_v25 }
  0x31   :  { %220 = vmatpush.bf16.msra.mxu1 %v414_v12 }
  0x34   :  { %303 = vmatpush.bf16.msra.mxu2 %v422_v26 }
  0xa0   :  { %v139_v20 = vpop.f32.mrf.mxu0 }
  0xa1   :  { %v140_v21 = vadd.f32 %v437_v19, %v139_v20 }
  0xa3   :  { %v143_v22 = vmax.f32 %v140_v21, 0.0 }
  0xa5   :  { %v144_v23 = vpack.c.bf16 %v143_v22, %v143_v22 }
  0xa7   :  { %221 = vmatmul.bf16.vlgmr.msra.gmra.mxu1 %v144_v23 }
  0xa8   :  { %v141_v24 = vpop.f32.mrf.mxu0 }
 0x124   :  { %v222_v28 = vpop.f32.mrf.mxu1 }
 0x125   :  { %v223_v29 = vadd.f32 %v438_v27, %v222_v28 }
 0x127   :  { %v226_v30 = vmax.f32 %v223_v29, 0.0 }
 0x129   :  { %v227_v31 = vpack.c.bf16 %v226_v30, %v226_v30 }
 0x12b   :  { %304 = vmatmul.bf16.vlgmr.msra.gmra.mxu2 %v227_v31 }
 0x12c   :  { %v224_v32 = vpop.f32.mrf.mxu1 }
 0x1ae   :  { %v305_v34 = vpop.f32.mrf.mxu2 }
 0x1af   :  { %v306_v35 = vadd.f32 %v439_v33, %v305_v34 }
 0x1b1   :  { %309 = vst [vmem:[#allocation10] sm:$0xff] %v306_v35 }
 0x1b2   :  { %320 = dma.vmem_to_hbm [thread:$0]  %s316_s25, 128, %s318_s28, [#allocation4]  }
 0x1b6   :  { %v307_v36 = vpop.f32.mrf.mxu2 }
 0x1b7   :  { %566 = dma.done.wait [#allocation4], 128  }
 0x1b8   :  { %567 = vsyncadd [#allocation4], 4294967168 }
 0x1b9   :  { %325 = vsyncpa [#allocation3], 1 }
 0x1ba   :  { %326 = vsyncpa [#allocation6], 1 }
 0x1bb   :  { %327 = vsyncpa [#allocation9], 1 }
 0x1bc   :  { %328 = vsyncpa [#allocation4], 1 }

</bundles_post_ra>
